<compile_context>
chip_gen: v7x
topology: tpu7x:2x2x1
jax: 0.10.0
libtpu: 0.0.40
codegen_flags: <defaults>
</compile_context>

<pallas_src>
import jax
import jax.numpy as jnp
from jax.experimental import pallas as pl
from jax.experimental.pallas import tpu as pltpu


def _cdiv(a, b):
    return (a + b - 1) // b


def _round_up(x, m):
    return _cdiv(x, m) * m


def _vmem_budget_bytes():
    """Conservative per-core VMEM budget for tile sizing / scoped limit."""
    cap = 64 * 1024 * 1024  # v7x per-TC VMEM: the smallest across generations
    try:
        info = pltpu.get_tpu_info()
        cap = int(getattr(info, "vmem_capacity_bytes", cap))
    except Exception:
        pass
    # Leave headroom for kernel-internal scratch / compiler temporaries,
    # and never ask for more than ~100 MiB even on 128 MiB parts.
    return min(cap * 3 // 4, 100 * 1024 * 1024)


def _lora_kernel(alpha_ref, x_ref, a_ref, b_ref, o_ref):
    # x @ A -> [tm, rank], f32 accumulation on the MXU.
    xa = jnp.dot(x_ref[...], a_ref[...], preferred_element_type=jnp.float32)
    # Scale the *small* intermediate with the SMEM scalar.
    xa = xa * alpha_ref[0]
    # (alpha * x @ A) @ B -> [tm, tn], f32 accumulation.
    out = jnp.dot(xa.astype(b_ref.dtype), b_ref[...],
                  preferred_element_type=jnp.float32)
    o_ref[...] = out.astype(o_ref.dtype)


def lora_forward(x, A, B, alpha=1.0, *, out_dtype=None, param_dtype=None):
    """y = alpha * (x @ A @ B).

    x: [..., in_dim], A: [in_dim, rank], B: [rank, out_dim].
    out_dtype:   output dtype (default: x.dtype).  Pass bf16 when the consumer
                 accepts it to halve the y writeback traffic.
    param_dtype: optional cast of A/B (tiny arrays, always cheap).  x is never
                 cast here — pass it already in the desired dtype.
    """
    orig_shape = x.shape
    in_dim = orig_shape[-1]
    x2 = x.reshape(-1, in_dim)
    batch = x2.shape[0]
    in_dim_a, rank = A.shape
    rank_b, out_dim = B.shape
    assert in_dim == in_dim_a and rank == rank_b

    if out_dtype is None:
        out_dtype = x.dtype
    if param_dtype is not None:
        # A/B are rank-sized: casting them is cheap and halves their VMEM cost.
        A = A.astype(param_dtype)
        B = B.astype(param_dtype)

    # Lane-dense output: pad out_dim (on tiny B only) to a multiple of 128.
    # TODO(synk): in a real module, hoist this pad (and param casts) to init.
    n_padded = _round_up(out_dim, 128)
    if n_padded != out_dim:
        B = jnp.pad(B, ((0, 0), (0, n_padded - out_dim)))

    x_bytes = jnp.dtype(x2.dtype).itemsize
    o_bytes = jnp.dtype(out_dtype).itemsize
    a_bytes = jnp.dtype(A.dtype).itemsize
    b_bytes = jnp.dtype(B.dtype).itemsize
    # Sub-32-bit dtypes pack 16 sublanes per vreg -> round tm to 16 then.
    sublane = 16 if (x_bytes < 4 or o_bytes < 4) else 8

    # N tile: caps the y block at tm x tn regardless of out_dim.
    tn = min(n_padded, 1024)

    # VMEM accounting (everything is double-buffered by the pipeline):
    #   2 * x tile + 2 * y tile + 2 * A + 2 * B tile  <= budget
    budget = _vmem_budget_bytes()
    tile_budget = int(budget * 0.9)
    const_bytes = 2 * (in_dim * rank * a_bytes + rank * tn * b_bytes)
    row_bytes = 2 * (in_dim * x_bytes + tn * o_bytes)

    if batch <= sublane:
        tm = batch  # block equals the full dim -> always legal
    else:
        tm_fit = max((tile_budget - const_bytes) // row_bytes, sublane)
        # Keep >= ~4 M tiles when the batch allows (pipeline + v7x megacore).
        tm_split = _round_up(_cdiv(batch, 4), sublane)
        tm = min(1024, tm_fit, tm_split)
        tm = max((tm // sublane) * sublane, sublane)

    grid = (_cdiv(batch, tm), _cdiv(n_padded, tn))

    alpha_arr = jnp.asarray([alpha], dtype=jnp.float32)

    y = pl.pallas_call(
        _lora_kernel,
        out_shape=jax.ShapeDtypeStruct((batch, n_padded), out_dtype),
        grid_spec=pltpu.PrefetchScalarGridSpec(
            num_scalar_prefetch=1,  # alpha -> SMEM scalar
            grid=grid,
            in_specs=[
                # x streams over M; constant over the inner N loop (no re-fetch).
                pl.BlockSpec((tm, in_dim), lambda i, j, alpha: (i, 0)),
                # A fully resident.
                pl.BlockSpec((in_dim, rank), lambda i, j, alpha: (0, 0)),
                # B tiled over N (tiny per tile).
                pl.BlockSpec((rank, tn), lambda i, j, alpha: (0, j)),
            ],
            out_specs=pl.BlockSpec((tm, tn), lambda i, j, alpha: (i, j)),
        ),
        compiler_params=pltpu.CompilerParams(
            dimension_semantics=("parallel", "parallel"),
            vmem_limit_bytes=budget,
        ),
    )(alpha_arr, x2, A, B)

    if n_padded != out_dim:
        y = y[:, :out_dim]
    return y.reshape(orig_shape[:-1] + (out_dim,))


if __name__ == "__main__":
    # Small, module-consistent shapes: batch=8, in_dim=32, rank=4, out_dim=64.
    batch, in_dim, rank, out_dim = 8, 32, 4, 64
    alpha = 2.0

    key = jax.random.PRNGKey(0)
    kx, ka, kb = jax.random.split(key, 3)

    x = jax.random.normal(kx, (batch, in_dim), dtype=jnp.float32)
    # Mirrors nn.Parameter(torch.randn(...) * 0.01)
    A = jax.random.normal(ka, (in_dim, rank), dtype=jnp.float32) * 0.01
    B = jax.random.normal(kb, (rank, out_dim), dtype=jnp.float32) * 0.01

    y_ref = alpha * (x @ A @ B)

    # f32 path: tight tolerance against the plain-JAX reference.
    y = lora_forward(x, A, B, alpha=alpha)
    jax.block_until_ready(y)
    assert y.shape == (batch, out_dim)
    assert jnp.allclose(y, y_ref, atol=1e-5, rtol=1e-5)

    # Ragged batch (not a multiple of the tile) exercises the cdiv-grid /
    # masked-last-block path that replaced the wrapper pad of x.
    x_rag = jax.random.normal(kx, (10, in_dim), dtype=jnp.float32)
    y_rag = lora_forward(x_rag, A, B, alpha=alpha)
    jax.block_until_ready(y_rag)
    assert y_rag.shape == (10, out_dim)
    assert jnp.allclose(y_rag, alpha * (x_rag @ A @ B), atol=1e-5, rtol=1e-5)

    # bf16-activations path: x already bf16 in "HBM", tiny params cast to bf16,
    # f32 accumulation inside the kernel, f32 output for the check.
    y_bf16 = lora_forward(x.astype(jnp.bfloat16), A, B, alpha=alpha,
                          param_dtype=jnp.bfloat16, out_dtype=jnp.float32)
    jax.block_until_ready(y_bf16)
    assert y_bf16.shape == (batch, out_dim)
    assert jnp.allclose(y_bf16, y_ref, atol=1e-4, rtol=5e-2)

    print("KERNEL_OK")
</pallas_src>

<mosaic_0001>
module attributes {stable_mosaic.version = 11 : i64} {
  func.func @_lora_kernel(%arg0: i32, %arg1: i32, %arg2: memref<1xf32, #tpu.memory_space<smem>>, %arg3: memref<8x32xf32, #tpu.memory_space<vmem>>, %arg4: memref<32x4xf32, #tpu.memory_space<vmem>>, %arg5: memref<4x128xf32, #tpu.memory_space<vmem>>, %arg6: memref<8x128xf32, #tpu.memory_space<vmem>>) attributes {dimension_semantics = [#tpu.dimension_semantics<parallel>, #tpu.dimension_semantics<parallel>], iteration_bounds = array<i64: 1, 1>, scalar_prefetch = 1 : i64, scratch_operands = 0 : i64, tpu.core_type = #tpu.core_type<tc>, window_params = [{transform_indices = @transform_0, window_bounds = array<i64: 8, 32>}, {pipeline_mode = #tpu.pipeline_mode<synchronous>, transform_indices = @transform_1, window_bounds = array<i64: 32, 4>}, {transform_indices = @transform_2, window_bounds = array<i64: 4, 128>}, {transform_indices = @transform_3, window_bounds = array<i64: 8, 128>}]} {
    %c0 = arith.constant 0 : index
    %c0_0 = arith.constant 0 : index
    %0 = vector.load %arg3[%c0, %c0_0] : memref<8x32xf32, #tpu.memory_space<vmem>>, vector<8x32xf32>
    %c0_1 = arith.constant 0 : index
    %c0_2 = arith.constant 0 : index
    %1 = vector.load %arg4[%c0_1, %c0_2] : memref<32x4xf32, #tpu.memory_space<vmem>>, vector<32x4xf32>
    %cst = arith.constant dense<0.000000e+00> : vector<8x4xf32>
    %2 = tpu.matmul %0, %1, %cst {dimension_numbers = #tpu.dot_dimension_numbers<[1], [0], [0], [1], [0, 0, 1, 1], [], []>} : vector<8x32xf32>, vector<32x4xf32>, vector<8x4xf32> -> vector<8x4xf32>
    %c0_3 = arith.constant 0 : index
    %3 = memref.load %arg2[%c0_3] : memref<1xf32, #tpu.memory_space<smem>>
    %4 = vector.broadcast %3 : f32 to vector<8x4xf32>
    %5 = arith.mulf %2, %4 : vector<8x4xf32>
    %c0_4 = arith.constant 0 : index
    %c0_5 = arith.constant 0 : index
    %6 = vector.load %arg5[%c0_4, %c0_5] : memref<4x128xf32, #tpu.memory_space<vmem>>, vector<4x128xf32>
    %cst_6 = arith.constant dense<0.000000e+00> : vector<8x128xf32>
    %7 = tpu.matmul %5, %6, %cst_6 {dimension_numbers = #tpu.dot_dimension_numbers<[1], [0], [0], [1], [0, 0, 1, 1], [], []>} : vector<8x4xf32>, vector<4x128xf32>, vector<8x128xf32> -> vector<8x128xf32>
    %c0_7 = arith.constant 0 : index
    %c0_8 = arith.constant 0 : index
    %8 = vector.load %arg6[%c0_7, %c0_8] : memref<8x128xf32, #tpu.memory_space<vmem>>, vector<8x128xf32>
    tpu.vector_store %arg6[%c0_7, %c0_8], %7 {strides = array<i32>} : memref<8x128xf32, #tpu.memory_space<vmem>>, vector<8x128xf32>,
    return
  }
  func.func @transform_0(%arg0: i32, %arg1: i32, %arg2: memref<1xf32, #tpu.memory_space<smem>>) -> (i32, i32) {
    %c0_i32 = arith.constant 0 : i32
    %c0_i32_0 = arith.constant 0 : i32
    return %arg0, %c0_i32 : i32, i32
  }
  func.func @transform_1(%arg0: i32, %arg1: i32, %arg2: memref<1xf32, #tpu.memory_space<smem>>) -> (i32, i32) {
    %c0_i32 = arith.constant 0 : i32
    %c0_i32_0 = arith.constant 0 : i32
    %c0_i32_1 = arith.constant 0 : i32
    return %c0_i32, %c0_i32_0 : i32, i32
  }
  func.func @transform_2(%arg0: i32, %arg1: i32, %arg2: memref<1xf32, #tpu.memory_space<smem>>) -> (i32, i32) {
    %c0_i32 = arith.constant 0 : i32
    %c0_i32_0 = arith.constant 0 : i32
    return %c0_i32, %arg1 : i32, i32
  }
  func.func @transform_3(%arg0: i32, %arg1: i32, %arg2: memref<1xf32, #tpu.memory_space<smem>>) -> (i32, i32) {
    %c0_i32 = arith.constant 0 : i32
    return %arg0, %arg1 : i32, i32
  }
}

</mosaic_0001>

<bundles_post_ra>
// kernel: tpu_custom_call.1
= control target key start
LH: loop header
LB: loop body
LE: loop exit
PB: predicated region body
PF: predicated region fallthrough
CT: control target
= control target key end

     0   :  { %v253_v3 = vmov 0.0|0.0   ;;  %vm254_vm0 = vmmov 0   ;;  %v255_v6 = vmov 0.0   ;;  %s315_s0 = inlined_call_operand.<no memory space> [shape: f32[1], index: 0, kind: input, shape index: {}]   ;;  %s316_s1 = inlined_call_operand.vmem [shape: f32[8,32], index: 1, kind: input, shape index: {}]   ;;  %s317_s2 = inlined_call_operand.vmem [shape: f32[32,4], index: 2, kind: input, shape index: {}]   ;;  %s318_s3 = inlined_call_operand.vmem [shape: f32[4,128], index: 3, kind: input, shape index: {}]   ;;  %s319_s4 = inlined_call_operand.hbm [shape: f32[8,128], index: 4, kind: output, shape index: {}]  }
   0x1   :  { %v18_v0 = vld [vmem:[%s317_s2] sm:$0xff]  ;;  %v19_v1 = vld [vmem:[%s317_s2 + $0x8] sm:$0xff]  ;;  %v20_v2 = vld [vmem:[%s317_s2 + $0x10] sm:$0xff]  ;;  %219 = vmatprep.subr.bf16.mxu0 %v253_v3  ;;  %211 = vmatprep.mubr.msk.f32.mxu0 %vm254_vm0, %v255_v6 }
   0x2   :  { %v220_v4 = vpack.c.bf16 %v19_v1, %v18_v0  ;;  %v21_v5 = vld [vmem:[%s317_s2 + $0x18] sm:$0xff] }
   0x3   :  { %10 = vsyncpa [#allocation5], 0  ;;  %214 = vmatprep.subr.mxu1 %v255_v6  ;;  %216 = vmatprep.mubr.msk.f32.mxu1 %vm254_vm0, %v255_v6  ;;  %v223_v7 = vpack.c.bf16 %v21_v5, %v20_v2  ;;  %v17_v8 = vld [vmem:[%s316_s1] sm:$0xff]  ;;  %vm22_vm1 = vcmask 261120   ;;  %vm104_vm2 = vcmask 1043456   ;;  %v97_v10 = vstv %s315_s0  ;;  %s256_s28 = smov [#allocation4]  }
   0x4   :  { %221 = vmatpush3.bf16.msra.mxu0 %v220_v4  ;;  %v99_v9 = vld [vmem:[%s318_s3] sm:$0xf]  ;;  %vm100_vm3 = vcmask 31744   ;;  %s185_s29 = sshll.u32 %s256_s28, 4  ;;  %s186_s29 = int_to_ptr.vmem [resolvable:$true] %s185_s29 }
   0x5   :  { %222 = vmatprep.subr.bf16.mxu0 %v253_v3  ;;  %215 = vmatpush3.msk.msra.mxu1 %vm104_vm2, %v99_v9  ;;  %s229_s1 = scalar_lea.vmem %s186_s29, 128  ;;  %p234_p1 = scmp.lt.s32.totalorder %s186_s29, %s186_s29 }
   0x6   :  { %p230_p0 = scmp.ne.s32.totalorder %s186_s29, %s229_s1  ;;  %p235_p2 = scmp.lt.s32.totalorder %s229_s1, %s229_s1 }
   0x8   :  { %224 = vmatpush3.bf16.msra.mxu0 %v223_v7  ;;  %p236_p3 = por %p235_p2, %p234_p1 }
   0xa   :  { %p237_p4 = pnand %p236_p3, %p230_p0 }
   0xb   :  { %212 = vmatmul.mubr.msk.f32.vlgmr.msra.gmra.mrb[0].mxu0 %vm22_vm1, %v17_v8 }
  0xde   :  { %v92_v11 = vpop.f32.mrb[0].mxu0 }
  0xdf   :  { %v98_v12 = vmul.f32 %v97_v10, %v92_v11  ;;  %v213_v13 = vpop.f32.mrb[1].mxu0 }
  0xe1   :  { %217 = vmatmul.mubr.msk.f32.vlgmr.msra.gmra.mrb[0].mxu1 %vm100_vm3, %v98_v12 }
 0x1b4   :  { %v174_v14 = vpop.f32.mrb[0].mxu1 }
 0x1b5   :  { %178 = vst [vmem:[#allocation4] sm:$0xff] %v174_v14  ;;  %v218_v15 = vpop.f32.mrb[1].mxu1 }
 0x1b6   :  { %240 = shalt.err (!%p237_p4)
}
 0x1b7   :  { %s241_s30 = scalar_lea.hbm %s319_s4, 128 }
 0x1b8   :  { %p242_p5 = scmp.ne.s32.totalorder %s319_s4, %s241_s30  ;;  %p245_p6 = scmp.lt.u32.totalorder %s241_s30, %s319_s4 }
 0x1ba   :  { %p247_p7 = pnand %p245_p6, %p242_p5 }
 0x1bc   :  { %250 = shalt.err (!%p247_p7)
}
 0x1bd   :  { %188 = dma.vmem_to_hbm [thread:$0]  %s186_s29, 128, %s319_s4, [#allocation5]  }
 0x1be   :  { %251 = dma.done.wait [#allocation5], 128  }
 0x1bf   :  { %252 = vsyncadd [#allocation5], 4294967168 }
 0x1c0   :  { %192 = vsyncpa [#allocation5], 1 }

</bundles_post_ra>
